<compile_context>
chip_gen: v7x
topology: tpu7x:2x2x1
jax: 0.10.0
libtpu: 0.0.40
codegen_flags: <defaults>
</compile_context>

<pallas_src>
import jax
import jax.numpy as jnp
from jax.experimental import pallas as pl
from jax.experimental.pallas import tpu as pltpu


_VMEM_BUDGET = 28 * 1024 * 1024      # conservative scoped-VMEM budget (all gens)
_VMEM_LIMIT = 32 * 1024 * 1024       # raise v5e's 16 MiB default; <= physical everywhere


def gated_transition_kernel(
    z_ref, eps_ref,
    wz_ref, bz_ref,        # fused [gate | proposed_mean | z_to_mu]: (Z, 3*Zp), (1, 3*Zp)
    wlv_ref, blv_ref,      # z_to_logvar Linear: (Z, Z), (1, Z)
    zt_ref, mu_ref, lv_ref,  # three native outputs, each (TILE_B, Z)
):
    Z = zt_ref.shape[1]
    Zp = wz_ref.shape[1] // 3                            # 128-lane-aligned segment width
    z = z_ref[...]                                       # (TILE_B, Z) f32
    eps = eps_ref[...]                                   # (TILE_B, Z) f32

    # One fused matmul for the three z-LHS linears; each segment is 128-lane aligned.
    fused = jnp.dot(z, wz_ref[...], preferred_element_type=jnp.float32) + bz_ref[...]
    gate = jax.nn.sigmoid(fused[:, :Z])                  # sigmoid(z @ Wg + bg)
    proposed_mean = fused[:, Zp:Zp + Z]                  # z @ Wp + bp
    z_mu = fused[:, 2 * Zp:2 * Zp + Z]                   # z @ Wmu + bmu

    # mu = (1 - gate) * z_to_mu(z) + gate * proposed_mean
    mu = (1.0 - gate) * z_mu + gate * proposed_mean

    # logvar = softplus(relu(proposed_mean) @ Wlv + blv)
    relu_pm = jnp.maximum(proposed_mean, 0.0)
    lv_lin = jnp.dot(relu_pm, wlv_ref[...], preferred_element_type=jnp.float32) + blv_ref[...]
    logvar = jnp.logaddexp(lv_lin, 0.0)                  # softplus

    # z_t = mu + epsilon * logvar   (reparameterized sample, as in the module)
    zt_ref[...] = mu + eps * logvar
    mu_ref[...] = mu
    lv_ref[...] = logvar


def _round_up(x, m):
    return ((x + m - 1) // m) * m


def _vmem_estimate(tb, Z, Zp):
    """Rough f32-bytes estimate of the per-step VMEM working set."""
    io = 2 * 2 * tb * Z                                   # z + eps, double-buffered
    out = 2 * 3 * tb * Z                                  # 3 outputs, double-buffered
    wts = 2 * (Z * 3 * Zp + 3 * Zp + Z * Z + Z)           # resident weights/biases
    tmp = tb * (3 * Zp + 6 * Z)                           # fused result + elementwise temps
    return 4 * (io + out + wts + tmp)


def _choose_tile_b(B, Z, Zp, tile_b):
    tb = min(int(tile_b), _round_up(B, 8))
    tb = max(8, _round_up(tb, 8))
    # Give the parallel grid >= 2 steps when possible so v7x's 2 TensorCores share work.
    if B > 8 and pl.cdiv(B, tb) < 2:
        tb = max(8, _round_up(pl.cdiv(B, 2), 8))
    # Shrink to fit the scoped-VMEM budget (covers v5e 16 MiB default / v7x 64 MiB physical).
    while tb > 8 and _vmem_estimate(tb, Z, Zp) > _VMEM_BUDGET:
        tb = max(8, _round_up(tb // 2, 8))
    return tb


def fuse_params(params):
    """Pack the three z-LHS linears into one 128-lane-aligned fused weight/bias.

    Done ONCE at parameter-setup time (hoisted out of the per-call hot path).
    """
    Z = params["w_gate"].shape[0]
    Zp = _round_up(Z, 128)
    pad = Zp - Z

    def padw(w):
        return jnp.pad(w, ((0, 0), (0, pad)))

    wz = jnp.concatenate([padw(params["w_gate"]), padw(params["w_prop"]),
                          padw(params["w_mu"])], axis=1)            # (Z, 3*Zp)
    bz = jnp.concatenate([padw(params["b_gate"]), padw(params["b_prop"]),
                          padw(params["b_mu"])], axis=1)             # (1, 3*Zp)
    return {"wz": wz, "bz": bz, "wlv": params["w_lv"], "blv": params["b_lv"]}


def gated_transition(z_t_1, eps, fused, tile_b=2048):
    """z_t_1, eps: (B, Z) float32. fused: output of fuse_params().

    Returns (z_t, mu, logvar), each (B, Z).
    """
    B, Z = z_t_1.shape
    Zp = fused["wz"].shape[1] // 3

    tb = _choose_tile_b(B, Z, Zp, tile_b)
    grid = (pl.cdiv(B, tb),)                  # partial last block handled by Pallas (no jnp.pad)
    row = lambda i: (i, 0)
    const = lambda i: (0, 0)                  # weights/biases stay VMEM-resident across the grid

    z_t, mu, logvar = pl.pallas_call(
        gated_transition_kernel,
        out_shape=(
            jax.ShapeDtypeStruct((B, Z), jnp.float32),
            jax.ShapeDtypeStruct((B, Z), jnp.float32),
            jax.ShapeDtypeStruct((B, Z), jnp.float32),
        ),
        grid=grid,
        in_specs=[
            pl.BlockSpec((tb, Z), row),           # z
            pl.BlockSpec((tb, Z), row),           # eps
            pl.BlockSpec((Z, 3 * Zp), const),     # fused weight
            pl.BlockSpec((1, 3 * Zp), const),     # fused bias
            pl.BlockSpec((Z, Z), const),          # logvar weight
            pl.BlockSpec((1, Z), const),          # logvar bias
        ],
        out_specs=(
            pl.BlockSpec((tb, Z), row),
            pl.BlockSpec((tb, Z), row),
            pl.BlockSpec((tb, Z), row),
        ),
        compiler_params=pltpu.CompilerParams(
            dimension_semantics=("parallel",),
            vmem_limit_bytes=_VMEM_LIMIT),
    )(z_t_1, eps, fused["wz"], fused["bz"], fused["wlv"], fused["blv"])

    return z_t, mu, logvar


def init_params(key, z_dim):
    """Parameter init mirroring GatedTransition.__init__ shapes.

    Weights are stored as (in, out) = transpose of nn.Linear's (out, in).
    z_to_mu is initialized to identity weight / zero bias, as in the module.
    """
    ks = jax.random.split(key, 6)
    bound = 1.0 / jnp.sqrt(z_dim)  # nn.Linear default uniform bound

    def lin_w(k):
        return jax.random.uniform(k, (z_dim, z_dim), jnp.float32, -bound, bound)

    def lin_b(k):
        return jax.random.uniform(k, (1, z_dim), jnp.float32, -bound, bound)

    return {
        "w_gate": lin_w(ks[0]), "b_gate": lin_b(ks[1]),
        "w_prop": lin_w(ks[2]), "b_prop": lin_b(ks[3]),
        "w_mu": jnp.eye(z_dim, dtype=jnp.float32),
        "b_mu": jnp.zeros((1, z_dim), jnp.float32),
        "w_lv": lin_w(ks[4]), "b_lv": lin_b(ks[5]),
    }


def gated_transition_ref(z, eps, p):
    """Plain-JAX reference for correctness checking."""
    gate = jax.nn.sigmoid(z @ p["w_gate"] + p["b_gate"])
    prop = z @ p["w_prop"] + p["b_prop"]
    mu = (1.0 - gate) * (z @ p["w_mu"] + p["b_mu"]) + gate * prop
    logvar = jax.nn.softplus(jnp.maximum(prop, 0.0) @ p["w_lv"] + p["b_lv"])
    return mu + eps * logvar, mu, logvar


if __name__ == "__main__":
    B, Z = 8, 32
    key = jax.random.PRNGKey(0)
    k_params, k_z, k_eps = jax.random.split(key, 3)

    params = init_params(k_params, Z)
    fused = fuse_params(params)          # hoisted: fusion done once, not per call

    z_t_1 = jax.random.normal(k_z, (B, Z), jnp.float32)
    # torch.randn equivalent, drawn outside the kernel (keeps JAX RNG semantics exact).
    eps = jax.random.normal(k_eps, (B, Z), jnp.float32)

    run = jax.jit(lambda z, e: gated_transition(z, e, fused))
    z_t, mu, logvar = jax.block_until_ready(run(z_t_1, eps))

    # sanity check against plain-JAX reference
    z_ref, mu_ref, lv_ref = gated_transition_ref(z_t_1, eps, params)
    assert jnp.allclose(z_t, z_ref, atol=1e-5, rtol=1e-5)
    assert jnp.allclose(mu, mu_ref, atol=1e-5, rtol=1e-5)
    assert jnp.allclose(logvar, lv_ref, atol=1e-5, rtol=1e-5)

    print("KERNEL_OK")
</pallas_src>

<mosaic_0001>
module attributes {stable_mosaic.version = 11 : i64} {
  func.func @gated_transition_kernel(%arg0: i32, %arg1: memref<8x32xf32, #tpu.memory_space<vmem>>, %arg2: memref<8x32xf32, #tpu.memory_space<vmem>>, %arg3: memref<32x384xf32, #tpu.memory_space<vmem>>, %arg4: memref<1x384xf32, #tpu.memory_space<vmem>>, %arg5: memref<32x32xf32, #tpu.memory_space<vmem>>, %arg6: memref<1x32xf32, #tpu.memory_space<vmem>>, %arg7: memref<8x32xf32, #tpu.memory_space<vmem>>, %arg8: memref<8x32xf32, #tpu.memory_space<vmem>>, %arg9: memref<8x32xf32, #tpu.memory_space<vmem>>) attributes {dimension_semantics = [#tpu.dimension_semantics<parallel>], iteration_bounds = array<i64: 1>, scalar_prefetch = 0 : i64, scratch_operands = 0 : i64, tpu.core_type = #tpu.core_type<tc>, window_params = [{transform_indices = @transform_0, window_bounds = array<i64: 8, 32>}, {transform_indices = @transform_1, window_bounds = array<i64: 8, 32>}, {pipeline_mode = #tpu.pipeline_mode<synchronous>, transform_indices = @transform_2, window_bounds = array<i64: 32, 384>}, {pipeline_mode = #tpu.pipeline_mode<synchronous>, transform_indices = @transform_3, window_bounds = array<i64: 1, 384>}, {pipeline_mode = #tpu.pipeline_mode<synchronous>, transform_indices = @transform_4, window_bounds = array<i64: 32, 32>}, {pipeline_mode = #tpu.pipeline_mode<synchronous>, transform_indices = @transform_5, window_bounds = array<i64: 1, 32>}, {transform_indices = @transform_6, window_bounds = array<i64: 8, 32>}, {transform_indices = @transform_7, window_bounds = array<i64: 8, 32>}, {transform_indices = @transform_8, window_bounds = array<i64: 8, 32>}]} {
    %c0 = arith.constant 0 : index
    %c0_0 = arith.constant 0 : index
    %0 = vector.load %arg1[%c0, %c0_0] : memref<8x32xf32, #tpu.memory_space<vmem>>, vector<8x32xf32>
    %c0_1 = arith.constant 0 : index
    %c0_2 = arith.constant 0 : index
    %1 = vector.load %arg2[%c0_1, %c0_2] : memref<8x32xf32, #tpu.memory_space<vmem>>, vector<8x32xf32>
    %c0_3 = arith.constant 0 : index
    %c0_4 = arith.constant 0 : index
    %2 = vector.load %arg3[%c0_3, %c0_4] : memref<32x384xf32, #tpu.memory_space<vmem>>, vector<32x384xf32>
    %cst = arith.constant dense<0.000000e+00> : vector<8x384xf32>
    %3 = tpu.matmul %0, %2, %cst {dimension_numbers = #tpu.dot_dimension_numbers<[1], [0], [0], [1], [0, 0, 1, 1], [], []>} : vector<8x32xf32>, vector<32x384xf32>, vector<8x384xf32> -> vector<8x384xf32>
    %c0_5 = arith.constant 0 : index
    %c0_6 = arith.constant 0 : index
    %4 = vector.load %arg4[%c0_5, %c0_6] : memref<1x384xf32, #tpu.memory_space<vmem>>, vector<1x384xf32>
    %5 = vector.broadcast %4 : vector<1x384xf32> to vector<8x384xf32>
    %6 = arith.addf %3, %5 : vector<8x384xf32>
    %7 = vector.extract_strided_slice %6 {offsets = [0, 0], sizes = [8, 32], strides = [1, 1]} : vector<8x384xf32> to vector<8x32xf32>
    %8 = arith.negf %7 : vector<8x32xf32>
    %9 = math.exp %8 : vector<8x32xf32>
    %cst_7 = arith.constant 1.000000e+00 : f32
    %10 = vector.broadcast %cst_7 : f32 to vector<8x32xf32>
    %11 = arith.addf %10, %9 : vector<8x32xf32>
    %12 = arith.divf %10, %11 : vector<8x32xf32>
    %13 = vector.extract_strided_slice %6 {offsets = [0, 128], sizes = [8, 32], strides = [1, 1]} : vector<8x384xf32> to vector<8x32xf32>
    %14 = vector.extract_strided_slice %6 {offsets = [0, 256], sizes = [8, 32], strides = [1, 1]} : vector<8x384xf32> to vector<8x32xf32>
    %cst_8 = arith.constant 1.000000e+00 : f32
    %15 = vector.broadcast %cst_8 : f32 to vector<8x32xf32>
    %16 = arith.subf %15, %12 : vector<8x32xf32>
    %17 = arith.mulf %16, %14 : vector<8x32xf32>
    %18 = arith.mulf %12, %13 : vector<8x32xf32>
    %19 = arith.addf %17, %18 : vector<8x32xf32>
    %cst_9 = arith.constant 0.000000e+00 : f32
    %20 = vector.broadcast %cst_9 : f32 to vector<8x32xf32>
    %21 = arith.maximumf %13, %20 : vector<8x32xf32>
    %c0_10 = arith.constant 0 : index
    %c0_11 = arith.constant 0 : index
    %22 = vector.load %arg5[%c0_10, %c0_11] : memref<32x32xf32, #tpu.memory_space<vmem>>, vector<32x32xf32>
    %cst_12 = arith.constant dense<0.000000e+00> : vector<8x32xf32>
    %23 = tpu.matmul %21, %22, %cst_12 {dimension_numbers = #tpu.dot_dimension_numbers<[1], [0], [0], [1], [0, 0, 1, 1], [], []>} : vector<8x32xf32>, vector<32x32xf32>, vector<8x32xf32> -> vector<8x32xf32>
    %c0_13 = arith.constant 0 : index
    %c0_14 = arith.constant 0 : index
    %24 = vector.load %arg6[%c0_13, %c0_14] : memref<1x32xf32, #tpu.memory_space<vmem>>, vector<1x32xf32>
    %25 = vector.broadcast %24 : vector<1x32xf32> to vector<8x32xf32>
    %26 = arith.addf %23, %25 : vector<8x32xf32>
    %cst_15 = arith.constant 0.000000e+00 : f32
    %27 = vector.broadcast %cst_15 : f32 to vector<8x32xf32>
    %28 = arith.maximumf %26, %27 : vector<8x32xf32>
    %29 = vector.broadcast %cst_15 : f32 to vector<8x32xf32>
    %30 = arith.subf %26, %29 : vector<8x32xf32>
    %31 = arith.cmpf one, %30, %30 : vector<8x32xf32>
    %32 = vector.broadcast %cst_15 : f32 to vector<8x32xf32>
    %33 = arith.addf %26, %32 : vector<8x32xf32>
    %34 = math.absf %30 : vector<8x32xf32>
    %cst_16 = arith.constant 0.000000e+00 : f32
    %35 = vector.broadcast %cst_16 : f32 to vector<8x32xf32>
    %36 = arith.subf %35, %34 : vector<8x32xf32>
    %37 = math.exp %36 : vector<8x32xf32>
    %38 = math.log1p %37 : vector<8x32xf32>
    %39 = arith.addf %28, %38 : vector<8x32xf32>
    %40 = arith.select %31, %33, %39 : vector<8x32xi1>, vector<8x32xf32>
    %41 = arith.mulf %1, %40 : vector<8x32xf32>
    %42 = arith.addf %19, %41 : vector<8x32xf32>
    %c0_17 = arith.constant 0 : index
    %c0_18 = arith.constant 0 : index
    %43 = vector.load %arg7[%c0_17, %c0_18] : memref<8x32xf32, #tpu.memory_space<vmem>>, vector<8x32xf32>
    tpu.vector_store %arg7[%c0_17, %c0_18], %42 {strides = array<i32>} : memref<8x32xf32, #tpu.memory_space<vmem>>, vector<8x32xf32>,
    %c0_19 = arith.constant 0 : index
    %c0_20 = arith.constant 0 : index
    %44 = vector.load %arg8[%c0_19, %c0_20] : memref<8x32xf32, #tpu.memory_space<vmem>>, vector<8x32xf32>
    tpu.vector_store %arg8[%c0_19, %c0_20], %19 {strides = array<i32>} : memref<8x32xf32, #tpu.memory_space<vmem>>, vector<8x32xf32>,
    %c0_21 = arith.constant 0 : index
    %c0_22 = arith.constant 0 : index
    %45 = vector.load %arg9[%c0_21, %c0_22] : memref<8x32xf32, #tpu.memory_space<vmem>>, vector<8x32xf32>
    tpu.vector_store %arg9[%c0_21, %c0_22], %40 {strides = array<i32>} : memref<8x32xf32, #tpu.memory_space<vmem>>, vector<8x32xf32>,
    return
  }
  func.func @transform_0(%arg0: i32) -> (i32, i32) {
    %c0_i32 = arith.constant 0 : i32
    %c0_i32_0 = arith.constant 0 : i32
    return %arg0, %c0_i32 : i32, i32
  }
  func.func @transform_1(%arg0: i32) -> (i32, i32) {
    %c0_i32 = arith.constant 0 : i32
    %c0_i32_0 = arith.constant 0 : i32
    return %arg0, %c0_i32 : i32, i32
  }
  func.func @transform_2(%arg0: i32) -> (i32, i32) {
    %c0_i32 = arith.constant 0 : i32
    %c0_i32_0 = arith.constant 0 : i32
    %c0_i32_1 = arith.constant 0 : i32
    return %c0_i32, %c0_i32_0 : i32, i32
  }
  func.func @transform_3(%arg0: i32) -> (i32, i32) {
    %c0_i32 = arith.constant 0 : i32
    %c0_i32_0 = arith.constant 0 : i32
    %c0_i32_1 = arith.constant 0 : i32
    return %c0_i32, %c0_i32_0 : i32, i32
  }
  func.func @transform_4(%arg0: i32) -> (i32, i32) {
    %c0_i32 = arith.constant 0 : i32
    %c0_i32_0 = arith.constant 0 : i32
    %c0_i32_1 = arith.constant 0 : i32
    return %c0_i32, %c0_i32_0 : i32, i32
  }
  func.func @transform_5(%arg0: i32) -> (i32, i32) {
    %c0_i32 = arith.constant 0 : i32
    %c0_i32_0 = arith.constant 0 : i32
    %c0_i32_1 = arith.constant 0 : i32
    return %c0_i32, %c0_i32_0 : i32, i32
  }
  func.func @transform_6(%arg0: i32) -> (i32, i32) {
    %c0_i32 = arith.constant 0 : i32
    %c0_i32_0 = arith.constant 0 : i32
    return %arg0, %c0_i32 : i32, i32
  }
  func.func @transform_7(%arg0: i32) -> (i32, i32) {
    %c0_i32 = arith.constant 0 : i32
    %c0_i32_0 = arith.constant 0 : i32
    return %arg0, %c0_i32 : i32, i32
  }
  func.func @transform_8(%arg0: i32) -> (i32, i32) {
    %c0_i32 = arith.constant 0 : i32
    %c0_i32_0 = arith.constant 0 : i32
    return %arg0, %c0_i32 : i32, i32
  }
}

</mosaic_0001>

<bundles_post_ra>
// kernel: _lambda_.1
= control target key start
LH: loop header
LB: loop body
LE: loop exit
PB: predicated region body
PF: predicated region fallthrough
CT: control target
= control target key end

     0   :  { %14 = vsyncpa [#allocation3], 0  ;;  %s817_s0 = inlined_call_operand.hbm [shape: f32[8,32], index: 0, kind: input, shape index: {}]   ;;  %s818_s1 = inlined_call_operand.hbm [shape: f32[8,32], index: 1, kind: input, shape index: {}]   ;;  %s819_s2 = inlined_call_operand.hbm [shape: f32[32,384], index: 2, kind: input, shape index: {}]   ;;  %s820_s3 = inlined_call_operand.vmem [shape: f32[1,384], index: 3, kind: input, shape index: {}]   ;;  %s821_s4 = inlined_call_operand.hbm [shape: f32[32,32], index: 4, kind: input, shape index: {}]   ;;  %s822_s5 = inlined_call_operand.vmem [shape: f32[1,32], index: 5, kind: input, shape index: {}]   ;;  %s823_s6 = inlined_call_operand.hbm [shape: f32[8,32], index: 6, kind: output, shape index: {0}]   ;;  %s824_s7 = inlined_call_operand.hbm [shape: f32[8,32], index: 7, kind: output, shape index: {1}]   ;;  %s825_s8 = inlined_call_operand.hbm [shape: f32[8,32], index: 8, kind: output, shape index: {2}]  }
   0x1   :  { %15 = vsyncpa [#allocation6], 0 }
   0x2   :  { %16 = vsyncpa [#allocation9], 0 }
   0x3   :  { %17 = vsyncpa [#allocation4], 0 }
   0x4   :  { %18 = vsyncpa [#allocation12], 0  ;;  %s660_s27 = smov [#allocation5]   ;;  %s661_s29 = smov [#allocation2]  }
   0x5   :  { %s35_s28 = sshll.u32 %s660_s27, 4  ;;  %s25_s30 = sshll.u32 %s661_s29, 4  ;;  %s36_s28 = int_to_ptr.vmem [resolvable:$true] %s35_s28  ;;  %s26_s30 = int_to_ptr.vmem [resolvable:$true] %s25_s30 }
   0x6   :  { %s496_s11 = scalar_lea.hbm %s818_s1, 128 }
   0x7   :  { %p497_p0 = scmp.ne.s32.totalorder %s818_s1, %s496_s11  ;;  %p500_p1 = scmp.lt.u32.totalorder %s496_s11, %s818_s1 }
   0x9   :  { %p502_p2 = pnand %p500_p1, %p497_p0 }
   0xb   :  { %505 = shalt.err (!%p502_p2)
}
   0xc   :  { %s506_s16 = scalar_lea.vmem %s36_s28, 128  ;;  %p511_p4 = scmp.lt.s32.totalorder %s36_s28, %s36_s28 }
   0xd   :  { %p507_p3 = scmp.ne.s32.totalorder %s36_s28, %s506_s16  ;;  %p512_p5 = scmp.lt.s32.totalorder %s506_s16, %s506_s16 }
   0xf   :  { %p513_p6 = por %p512_p5, %p511_p4 }
  0x11   :  { %p514_p7 = pnand %p513_p6, %p507_p3 }
  0x13   :  { %517 = shalt.err (!%p514_p7)
}
  0x14   :  { %38 = dma.hbm_to_vmem [thread:$0]  %s818_s1, 128, %s36_s28, [#allocation6]  }
  0x15   :  { %s518_s21 = scalar_lea.hbm %s817_s0, 128 }
  0x16   :  { %p519_p8 = scmp.ne.s32.totalorder %s817_s0, %s518_s21  ;;  %p522_p9 = scmp.lt.u32.totalorder %s518_s21, %s817_s0 }
  0x18   :  { %p524_p10 = pnand %p522_p9, %p519_p8 }
  0x1a   :  { %527 = shalt.err (!%p524_p10)
}
  0x1b   :  { %s528_s26 = scalar_lea.vmem %s26_s30, 128  ;;  %p533_p12 = scmp.lt.s32.totalorder %s26_s30, %s26_s30 }
  0x1c   :  { %p529_p11 = scmp.ne.s32.totalorder %s26_s30, %s528_s26  ;;  %p534_p13 = scmp.lt.s32.totalorder %s528_s26, %s528_s26 }
  0x1e   :  { %p535_p0 = por %p534_p13, %p533_p12 }
  0x20   :  { %p536_p1 = pnand %p535_p0, %p529_p11 }
  0x22   :  { %539 = shalt.err (!%p536_p1)
}
  0x23   :  { %28 = dma.hbm_to_vmem [thread:$0]  %s817_s0, 128, %s26_s30, [#allocation3]  }
  0x24   :  { %s662_s28 = smov [#allocation7]   ;;  %s540_s11 = scalar_lea.hbm %s819_s2, 1536 }
  0x25   :  { %s44_s29 = sshll.u32 %s662_s28, 4  ;;  %p541_p2 = scmp.ne.s32.totalorder %s819_s2, %s540_s11  ;;  %s45_s29 = int_to_ptr.vmem [resolvable:$true] %s44_s29 }
  0x26   :  { %p544_p3 = scmp.lt.u32.totalorder %s540_s11, %s819_s2 }
  0x28   :  { %p546_p4 = pnand %p544_p3, %p541_p2 }
  0x2a   :  { %549 = shalt.err (!%p546_p4)
}
  0x2b   :  { %s550_s16 = scalar_lea.vmem %s45_s29, 1536  ;;  %p555_p6 = scmp.lt.s32.totalorder %s45_s29, %s45_s29 }
  0x2c   :  { %p551_p5 = scmp.ne.s32.totalorder %s45_s29, %s550_s16  ;;  %p556_p7 = scmp.lt.s32.totalorder %s550_s16, %s550_s16 }
  0x2e   :  { %p557_p8 = por %p556_p7, %p555_p6 }
  0x30   :  { %p558_p9 = pnand %p557_p8, %p551_p5 }
  0x32   :  { %561 = shalt.err (!%p558_p9)
}
  0x33   :  { %s663_s0 = smov 384   ;;  %s664_s30 = smov 24  }
  0x34   :  { %50 = dma.hbm_to_vmem [thread:$0]  %s819_s2, 1536, %s45_s29, [#allocation6], %s663_s0, %s663_s0, %s664_s30  }
  0x35   :  { %s665_s19 = smov [#allocation8]   ;;  %s562_s23 = scalar_lea.hbm %s821_s4, 512 }
  0x36   :  { %s58_s20 = sshll.u32 %s665_s19, 4  ;;  %p563_p10 = scmp.ne.s32.totalorder %s821_s4, %s562_s23  ;;  %s59_s20 = int_to_ptr.vmem [resolvable:$true] %s58_s20 }
  0x37   :  { %p566_p11 = scmp.lt.u32.totalorder %s562_s23, %s821_s4 }
  0x39   :  { %p568_p12 = pnand %p566_p11, %p563_p10 }
  0x3b   :  { %571 = shalt.err (!%p568_p12)
}
  0x3c   :  { %s572_s27 = scalar_lea.vmem %s59_s20, 512  ;;  %p577_p0 = scmp.lt.s32.totalorder %s59_s20, %s59_s20 }
  0x3d   :  { %p573_p13 = scmp.ne.s32.totalorder %s59_s20, %s572_s27  ;;  %p578_p1 = scmp.lt.s32.totalorder %s572_s27, %s572_s27 }
  0x3f   :  { %p579_p2 = por %p578_p1, %p577_p0 }
  0x41   :  { %p580_p3 = pnand %p579_p2, %p573_p13 }
  0x43   :  { %583 = shalt.err (!%p580_p3)
}
  0x44   :  { %s666_s2 = smov 128   ;;  %s667_s28 = smov 8  }
  0x45   :  { %64 = dma.hbm_to_vmem [thread:$0]  %s821_s4, 512, %s59_s20, [#allocation9], %s666_s2, %s666_s2, %s667_s28  }
  0x46   :  { %650 = dma.done.wait [#allocation3], 128  }
  0x47   :  { %651 = vsyncadd [#allocation3], 4294967168 }
  0x48   :  { %652 = dma.done.wait [#allocation6], 1664  }
  0x49   :  { %653 = vsyncadd [#allocation6], 4294965632 }
  0x4a   :  { %654 = dma.done.wait [#allocation9], 512  }
  0x4b   :  { %655 = vsyncadd [#allocation9], 4294966784  ;;  %v668_v0 = vmov 0.0   ;;  %v669_v1 = vmov 0.0|0.0   ;;  %vm670_vm0 = vmmov 0   ;;  %v82_v2 = vld [vmem:[#allocation7 + $0x8] sm:$0xff]  ;;  %v95_v27 = vlaneseq }
  0x4c   :  { %178 = vmatprep.mubr.f32.mxu0 %v668_v0  ;;  %462 = vmatprep.subr.bf16.mxu1 %v669_v1  ;;  %v85_v3 = vld [vmem:[#allocation7 + $0x20] sm:$0xff]  ;;  %v84_v6 = vld [vmem:[#allocation7 + $0x18] sm:$0xff]  ;;  %v91_v8 = vld [vmem:[#allocation7 + $0x50] sm:$0xff]  ;;  %vm110_vm1 = vcmask 261120  }
  0x4d   :  { %440 = vmatprep.mubr.msk.f32.mxu1 %vm670_vm0, %v668_v0  ;;  %v81_v4 = vld [vmem:[#allocation7] sm:$0xff]  ;;  %v454_v5 = vpack.c.bf16 %v85_v3, %v82_v2  ;;  %v88_v7 = vld [vmem:[#allocation7 + $0x38] sm:$0xff]  ;;  %v87_v11 = vld [vmem:[#allocation7 + $0x30] sm:$0xff]  ;;  %v96_v28 = vshrl.u32 %v95_v27, 7 }
  0x4e   :  { %v456_v9 = vpack.c.bf16 %v84_v6, %v81_v4  ;;  %v458_v10 = vpack.c.bf16 %v91_v8, %v88_v7  ;;  %v90_v12 = vld [vmem:[#allocation7 + $0x48] sm:$0xff]  ;;  %v83_v13 = vld [vmem:[#allocation7 + $0x10] sm:$0xff]  ;;  %v89_v15 = vld [vmem:[#allocation7 + $0x40] sm:$0xff] }
  0x4f   :  { %455 = vmatprep.subr.bf16.mxu0 %v454_v5  ;;  %v86_v14 = vld [vmem:[#allocation7 + $0x28] sm:$0xff]  ;;  %v460_v16 = vpack.c.bf16 %v90_v12, %v87_v11  ;;  %v92_v18 = vld [vmem:[#allocation7 + $0x58] sm:$0xff]  ;;  %v266_v19 = vld [vmem:[#allocation8] sm:$0xff]  ;;  %v97_v29 = vsub.s32 0, %v96_v28  ;;  %v101_v31 = vsub.s32 1, %v96_v28  ;;  %v105_v44 = vsub.s32 2, %v96_v28 }
  0x50   :  { %457 = vmatpush1.bf16.msra.mxu0 %v456_v9  ;;  %v463_v17 = vpack.c.bf16 %v86_v14, %v83_v13  ;;  %v267_v20 = vld [vmem:[#allocation8 + $0x8] sm:$0xff]  ;;  %v466_v21 = vpack.c.bf16 %v92_v18, %v89_v15  ;;  %v79_v22 = vld [vmem:[#allocation2] sm:$0xff]  ;;  %v269_v25 = vld [vmem:[#allocation8 + $0x18] sm:$0xff] }
  0x51   :  { %459 = vmatprep.subr.bf16.mxu0 %v458_v10  ;;  %v469_v23 = vpack.c.bf16 %v267_v20, %v266_v19  ;;  %v268_v24 = vld [vmem:[#allocation8 + $0x10] sm:$0xff] }
  0x52   :  { %464 = vmatpush3.bf16.msra.mxu1 %v463_v17  ;;  %v472_v26 = vpack.c.bf16 %v269_v25, %v268_v24  ;;  %v93_v30 = vld [vmem:[%s820_s3] sm:$0x7]  ;;  %s671_s3 = smov [#allocation11]  }
  0x53   :  { %465 = vmatprep.subr.bf16.mxu1 %v669_v1  ;;  %v98_v32 = vrot.slane %v93_v30, %v97_v29  ;;  %v102_v33 = vrot.slane %v93_v30, %v101_v31  ;;  %v106_v45 = vrot.slane %v93_v30, %v105_v44  ;;  %s389_s11 = sshll.u32 %s671_s3, 4  ;;  %s390_s11 = int_to_ptr.vmem [resolvable:$true] %s389_s11 }
  0x54   :  { %461 = vmatpush1.bf16.msra.mxu0 %v460_v16  ;;  %s584_s12 = scalar_lea.vmem %s390_s11, 128  ;;  %p589_p5 = scmp.lt.s32.totalorder %s390_s11, %s390_s11 }
  0x55   :  { %468 = vmatprep.subr.bf16.mxu0 %v669_v1  ;;  %p585_p4 = scmp.ne.s32.totalorder %s390_s11, %s584_s12  ;;  %p590_p6 = scmp.lt.s32.totalorder %s584_s12, %s584_s12 }
  0x56   :  { %467 = vmatpush3.bf16.msra.mxu1 %v466_v21 }
  0x57   :  { %417 = vmatmul.mubr.msk.f32.vlgmr.msra.gmra.mrb[0].mxu0 %vm110_vm1, %v79_v22  ;;  %p591_p7 = por %p590_p6, %p589_p5 }
  0x58   :  { %470 = vmatpush3.bf16.msra.mxu0 %v469_v23  ;;  %451 = vmatprep.mubr.msk.f32.mxu0 %vm670_vm0, %v668_v0 }
  0x59   :  { %441 = vmatmul.mubr.msk.f32.vlgmr.msra.gmra.mrb[0].mxu1 %vm110_vm1, %v79_v22  ;;  %471 = vmatprep.subr.bf16.mxu0 %v669_v1  ;;  %p592_p8 = pnand %p591_p7, %p585_p4 }
  0x5c   :  { %473 = vmatpush3.bf16.msra.mxu0 %v472_v26 }
 0x12a   :  { %v180_v34 = vpop.f32.mrb[0].mxu0 }
 0x12b   :  { %v181_v35 = vadd.f32 %v180_v34, %v98_v32  ;;  %v182_v36 = vpop.f32.mrb[1].mxu0 }
 0x12c   :  { %v183_v37 = vadd.f32 %v182_v36, %v102_v33  ;;  %v251_v38 = vpop.f32.mrb[0].mxu1 }
 0x12d   :  { %v419_v39 = vmul.f32 -1.442695, %v181_v35  ;;  %v442_v40 = vpop.f32.mrb[1].mxu1  ;;  %v252_v46 = vadd.f32 %v251_v38, %v106_v45 }
 0x12e   :  { %v265_v41 = vmax.f32 %v183_v37, 0.0 }
 0x12f   :  { %488 = vpow2.f32 %v419_v39 }
 0x130   :  { %452 = vmatmul.mubr.msk.f32.vlgmr.msra.gmra.mrb[2].mxu0 %vm110_vm1, %v265_v41 }
 0x139   :  { %v489_v42 = vpop.eup %488 }
 0x13a   :  { %v258_v43 = vadd.f32 1.0, %v489_v42 }
 0x13c   :  { %490 = vrcp.f32 %v258_v43 }
 0x146   :  { %v491_v47 = vpop.eup %490 }
 0x147   :  { %v263_v48 = vmul.f32 %v491_v47, %v183_v37  ;;  %v261_v49 = vsub.f32 1.0, %v491_v47 }
 0x149   :  { %v262_v50 = vmul.f32 %v261_v49, %v252_v46 }
 0x14b   :  { %v264_v51 = vadd.f32 %v263_v48, %v262_v50 }
 0x14d   :  { %371 = vst.msk [vmem:[#allocation11] sm:$0xff] %vm110_vm1, %v264_v51 }
 0x14e   :  { %595 = shalt.err (!%p592_p8)
}
 0x14f   :  { %s596_s15 = scalar_lea.hbm %s824_s7, 128 }
 0x150   :  { %p597_p9 = scmp.ne.s32.totalorder %s824_s7, %s596_s15  ;;  %p600_p10 = scmp.lt.u32.totalorder %s596_s15, %s824_s7 }
 0x152   :  { %p602_p11 = pnand %p600_p10, %p597_p9 }
 0x154   :  { %605 = shalt.err (!%p602_p11)
}
 0x155   :  { %392 = dma.vmem_to_hbm [thread:$0]  %s390_s11, 128, %s824_s7, [#allocation12]   ;;  %v420_v52 = vld [vmem:[%s822_s5] ss:$0 sm:$0xff]  ;;  %v80_v6 = vld [vmem:[#allocation5] sm:$0xff] }
 0x156   :  { %s672_s7 = smov [#allocation13]   ;;  %s673_s22 = smov [#allocation10]  }
 0x157   :  { %s399_s5 = sshll.u32 %s672_s7, 4  ;;  %s379_s23 = sshll.u32 %s673_s22, 4  ;;  %s400_s5 = int_to_ptr.vmem [resolvable:$true] %s399_s5  ;;  %s380_s23 = int_to_ptr.vmem [resolvable:$true] %s379_s23 }
 0x158   :  { %s606_s24 = scalar_lea.vmem %s400_s5, 128  ;;  %p611_p13 = scmp.lt.s32.totalorder %s400_s5, %s400_s5 }
 0x159   :  { %p607_p12 = scmp.ne.s32.totalorder %s400_s5, %s606_s24  ;;  %p612_p0 = scmp.lt.s32.totalorder %s606_s24, %s606_s24 }
 0x15b   :  { %p613_p1 = por %p612_p0, %p611_p13 }
 0x15d   :  { %p614_p2 = pnand %p613_p1, %p607_p12 }
 0x203   :  { %v346_v53 = vpop.f32.mrb[2].mxu0 }
 0x204   :  { %v347_v54 = vadd.f32 %v420_v52, %v346_v53  ;;  %v453_v55 = vpop.f32.mrb[3].mxu0 }
 0x206   :  { %v353_v56 = vand.u32 2147483647, %v347_v54  ;;  %v350_v3 = vmax.f32 %v347_v54, 0.0  ;;  %vm351_vm3 = vcmp.ne.f32.partialorder %v347_v54, %v347_v54 }
 0x208   :  { %v354_v57 = vsub.f32 0.0, %v353_v56 }
 0x20a   :  { %v355_v58 = vmul.f32 1.442695, %v354_v57 }
 0x20c   :  { %492 = vpow2.f32 %v355_v58 }
 0x216   :  { %v493_v59 = vpop.eup %492 }
 0x217   :  { %v357_v60 = vadd.f32 1.0, %v493_v59  ;;  %v360_v61 = vmul.f32 -0.5, %v493_v59  ;;  %v363_v63 = vand.u32 2147483647, %v493_v59 }
 0x219   :  { %494 = vlog2.f32 %v357_v60  ;;  %v361_v62 = vadd.f32 1.0, %v360_v61  ;;  %vm364_vm2 = vcmp.lt.f32.partialorder %v363_v63, 0.0004427343 }
 0x21b   :  { %v362_v2 = vmul.f32 %v493_v59, %v361_v62 }
 0x223   :  { %v495_v0 = vpop.eup %494 }
 0x224   :  { %v359_v1 = vmul.f32 0.6931472, %v495_v0 }
 0x226   :  { %v365_v4 = vsel %vm364_vm2, %v362_v2, %v359_v1 }
 0x227   :  { %v366_v5 = vadd.f32 %v365_v4, %v350_v3 }
 0x229   :  { %v367_v7 = vsel %vm351_vm3, %v347_v54, %v366_v5 }
 0x22a   :  { %372 = vst.msk [vmem:[#allocation13] sm:$0xff] %vm110_vm1, %v367_v7  ;;  %v368_v8 = vmul.f32 %v367_v7, %v80_v6 }
 0x22b   :  { %617 = shalt.err (!%p614_p2)
}
 0x22c   :  { %s618_s1 = scalar_lea.hbm %s825_s8, 128 }
 0x22d   :  { %p619_p3 = scmp.ne.s32.totalorder %s825_s8, %s618_s1  ;;  %p622_p4 = scmp.lt.u32.totalorder %s618_s1, %s825_s8 }
 0x22f   :  { %p624_p5 = pnand %p622_p4, %p619_p3 }
 0x231   :  { %627 = shalt.err (!%p624_p5)
}
 0x232   :  { %402 = dma.vmem_to_hbm [thread:$0]  %s400_s5, 128, %s825_s8, [#allocation12]   ;;  %v369_v9 = vadd.f32 %v368_v8, %v264_v51 }
 0x233   :  { %s628_s10 = scalar_lea.vmem %s380_s23, 128  ;;  %p633_p7 = scmp.lt.s32.totalorder %s380_s23, %s380_s23 }
 0x234   :  { %370 = vst.msk [vmem:[#allocation10] sm:$0xff] %vm110_vm1, %v369_v9  ;;  %p629_p6 = scmp.ne.s32.totalorder %s380_s23, %s628_s10  ;;  %p634_p8 = scmp.lt.s32.totalorder %s628_s10, %s628_s10 }
 0x236   :  { %p635_p9 = por %p634_p8, %p633_p7 }
 0x238   :  { %p636_p10 = pnand %p635_p9, %p629_p6 }
 0x23a   :  { %639 = shalt.err (!%p636_p10)
}
 0x23b   :  { %s640_s12 = scalar_lea.hbm %s823_s6, 128 }
 0x23c   :  { %p641_p11 = scmp.ne.s32.totalorder %s823_s6, %s640_s12  ;;  %p644_p12 = scmp.lt.u32.totalorder %s640_s12, %s823_s6 }
 0x23e   :  { %p646_p13 = pnand %p644_p12, %p641_p11 }
 0x240   :  { %649 = shalt.err (!%p646_p13)
}
 0x241   :  { %382 = dma.vmem_to_hbm [thread:$0]  %s380_s23, 128, %s823_s6, [#allocation4]  }
 0x242   :  { %656 = dma.done.wait [#allocation4], 128  }
 0x243   :  { %657 = vsyncadd [#allocation4], 4294967168 }
 0x244   :  { %658 = dma.done.wait [#allocation12], 256  }
 0x245   :  { %659 = vsyncadd [#allocation12], 4294967040 }
 0x246   :  { %412 = vsyncpa [#allocation3], 1 }
 0x247   :  { %413 = vsyncpa [#allocation6], 1 }
 0x248   :  { %414 = vsyncpa [#allocation9], 1 }
 0x249   :  { %415 = vsyncpa [#allocation4], 1 }
 0x24a   :  { %416 = vsyncpa [#allocation12], 1 }

</bundles_post_ra>
